<compile_context>
chip_gen: v7x
topology: tpu7x:2x2x1
jax: 0.10.0
libtpu: 0.0.40
codegen_flags: <defaults>
</compile_context>

<pallas_src>
import numpy as np
import jax
import jax.numpy as jnp
from jax.experimental import pallas as pl
from jax.experimental.pallas import tpu as pltpu

K_CONST = 0.5  # BaseModel default k


def swa_kernel(s_norm_ref, x_ref, resp_ref, scale_ref, p_ref, out_ref):
    """One grid step = one lane-dense tile of TB trials.

    s_norm_ref : (N, N)   normalized weights (row 0 = s1, rows 1.. = s2), resident
    x_ref      : (N, TB)  item orientations for this trial tile (radians)
    resp_ref   : (1, TB)  responses for this trial tile (radians)
    scale_ref  : (1, 1)   relu(scale)   (trial-invariant, hoisted to wrapper)
    p_ref      : (1, 1)   clip(p, 0, 1) (trial-invariant, hoisted to wrapper)
    out_ref    : (1, TB)  per-trial NLL contributions (summed over the N rows)
    """
    # raw_mean_likelihood core: weighted_mean = s_norm @ X  -> (N, TB), lane-dense.
    wm = jnp.dot(s_norm_ref[...], x_ref[...], preferred_element_type=jnp.float32)
    dist = (jnp.pi / 4.0) - jnp.abs(wm - resp_ref[...])        # resp broadcasts over rows
    lik = 1.0 / (1.0 + jnp.exp(-(scale_ref[...] * dist)))      # sigmoid (EUP exp)

    # total_log_likelihood, per element; reduce over the N (sublane) axis only.
    # The final reduction over trials is done in the wrapper on the lane-dense output.
    p = p_ref[...]
    total = p * K_CONST + (1.0 - p) * lik
    out_ref[...] = jnp.sum(-jnp.log(total * 0.99 + 0.005), axis=0, keepdims=True)


def simple_weighted_average_forward(X, resp, p, s1, s2, scale, *, tb=1024):
    """X: (N, T) radians (N = X.shape[0] = self.n); resp: (T,) radians;
    s1, s2: (1, N); p, scale: scalars.  Returns the scalar negative log-likelihood."""
    X = jnp.asarray(X, jnp.float32)
    resp = jnp.asarray(resp, jnp.float32)
    N, T = X.shape

    # ---- trial-invariant parameter processing (hoisted out of the kernel) ----
    # get_s(): torch.cat((s1, s2.repeat(n - 1, 1)))
    s = jnp.concatenate(
        [jnp.asarray(s1, jnp.float32),
         jnp.tile(jnp.asarray(s2, jnp.float32), (N - 1, 1))], axis=0)          # (N, N)
    # process_s_scale()
    scale_r = jnp.maximum(jnp.asarray(scale, jnp.float32), 0.0)
    s_r = jnp.maximum(s, 0.0)
    s_norm = s_r / jnp.sum(s_r)
    # clamp(p, 0, 1)
    p_c = jnp.clip(jnp.asarray(p, jnp.float32), 0.0, 1.0)

    # ---- trial tiling: lane-dense TB-wide blocks over the trial axis ----
    if T <= tb:
        TB, num_tiles = T, 1            # single step, full-extent block (no lane constraint)
    else:
        TB = tb                         # multiple of 128
        num_tiles = -(-T // TB)
    T_pad = TB * num_tiles
    if T_pad != T:                      # lane padding; padded columns are dropped before the sum
        X = jnp.pad(X, ((0, 0), (0, T_pad - T)))
        resp = jnp.pad(resp, (0, T_pad - T))

    resp_row = resp.reshape(1, T_pad)
    scale_11 = scale_r.reshape(1, 1)
    p_11 = p_c.reshape(1, 1)

    out = pl.pallas_call(
        swa_kernel,
        out_shape=jax.ShapeDtypeStruct((1, T_pad), jnp.float32),
        grid=(num_tiles,),
        in_specs=[
            pl.BlockSpec((N, N), lambda t: (0, 0)),     # s_norm (resident)
            pl.BlockSpec((N, TB), lambda t: (0, t)),    # X, one trial tile per step
            pl.BlockSpec((1, TB), lambda t: (0, t)),    # resp, lane-dense row per step
            pl.BlockSpec((1, 1), lambda t: (0, 0)),     # relu(scale)
            pl.BlockSpec((1, 1), lambda t: (0, 0)),     # clip(p)
        ],
        out_specs=pl.BlockSpec((1, TB), lambda t: (0, t)),   # per-trial NLL (lane-dense)
        compiler_params=pltpu.CompilerParams(
            dimension_semantics=("parallel",)),         # disjoint output tiles -> no race
    )(s_norm, X, resp_row, scale_11, p_11)

    # Final reduction over trials (drop lane padding) in the wrapper.
    return jnp.sum(out[0, :T])


def reference_forward(X, resp, p, s1, s2, scale):
    # Pure-JAX line-by-line mirror of SimpleWeightedAverage.forward().
    n = X.shape[0]
    p_c = jnp.clip(p, 0.0, 1.0)
    s = jnp.concatenate([s1, jnp.tile(s2, (n - 1, 1))], axis=0)
    scale_r = jnp.maximum(scale, 0.0)
    s_r = jnp.maximum(s, 0.0)
    s_norm = s_r / jnp.sum(s_r)
    weighted_mean = s_norm @ X
    dist = jnp.pi / 4.0 - jnp.abs(weighted_mean - resp[None, :])
    lik = 1.0 / (1.0 + jnp.exp(-(scale_r * dist)))
    total = p_c * K_CONST + (1.0 - p_c) * lik
    return -jnp.sum(jnp.log(total * 0.99 + 0.005))


if __name__ == "__main__":
    key = jax.random.PRNGKey(0)
    N, T = 16, 8     # N ensemble items per trial (= self.n = X.shape[0]), T trials

    k_x, k_r, k_s1, k_s2 = jax.random.split(key, 4)
    # Data in degrees -> radians, mirroring BaseModel.set_data.
    X_deg = jax.random.uniform(k_x, (N, T), minval=0.0, maxval=180.0, dtype=jnp.float32)
    resp_deg = jax.random.uniform(k_r, (T,), minval=0.0, maxval=180.0, dtype=jnp.float32)
    X = X_deg * (np.pi / 180.0)
    resp = resp_deg * (np.pi / 180.0)

    # Parameters (s1, s2 as (1, N) rows so get_s()/matmul are shape-consistent; positive so
    # the relu-normalization in process_s_scale never divides by zero).
    s1 = jnp.abs(jax.random.normal(k_s1, (1, N), dtype=jnp.float32)) + 0.1
    s2 = jnp.abs(jax.random.normal(k_s2, (1, N), dtype=jnp.float32)) + 0.1
    p = jnp.float32(0.3)
    scale = jnp.float32(2.0)

    out = simple_weighted_average_forward(X, resp, p, s1, s2, scale)
    out = jax.block_until_ready(out)
    ref = reference_forward(X, resp, p, s1, s2, scale)
    np.testing.assert_allclose(np.asarray(out), np.asarray(ref), rtol=1e-3, atol=1e-3)

    # Larger case exercising the tiled + lane-padded path (T not a multiple of the tile width).
    k_x2, k_r2 = jax.random.split(k_x, 2)
    T2 = 1300
    X2 = jax.random.uniform(k_x2, (N, T2), minval=0.0, maxval=float(np.pi), dtype=jnp.float32)
    resp2 = jax.random.uniform(k_r2, (T2,), minval=0.0, maxval=float(np.pi), dtype=jnp.float32)
    out2 = jax.block_until_ready(
        simple_weighted_average_forward(X2, resp2, p, s1, s2, scale, tb=512))
    ref2 = reference_forward(X2, resp2, p, s1, s2, scale)
    np.testing.assert_allclose(np.asarray(out2), np.asarray(ref2), rtol=2e-3, atol=1e-2)

    print("KERNEL_OK")
</pallas_src>

<mosaic_0001>
module attributes {stable_mosaic.version = 11 : i64} {
  func.func @swa_kernel(%arg0: i32, %arg1: memref<16x16xf32, #tpu.memory_space<vmem>>, %arg2: memref<16x8xf32, #tpu.memory_space<vmem>>, %arg3: memref<1x8xf32, #tpu.memory_space<vmem>>, %arg4: memref<1x1xf32, #tpu.memory_space<vmem>>, %arg5: memref<1x1xf32, #tpu.memory_space<vmem>>, %arg6: memref<1x8xf32, #tpu.memory_space<vmem>>) attributes {dimension_semantics = [#tpu.dimension_semantics<parallel>], iteration_bounds = array<i64: 1>, scalar_prefetch = 0 : i64, scratch_operands = 0 : i64, tpu.core_type = #tpu.core_type<tc>, window_params = [{pipeline_mode = #tpu.pipeline_mode<synchronous>, transform_indices = @transform_0, window_bounds = array<i64: 16, 16>}, {transform_indices = @transform_1, window_bounds = array<i64: 16, 8>}, {transform_indices = @transform_2, window_bounds = array<i64: 1, 8>}, {pipeline_mode = #tpu.pipeline_mode<synchronous>, transform_indices = @transform_3, window_bounds = array<i64: 1, 1>}, {pipeline_mode = #tpu.pipeline_mode<synchronous>, transform_indices = @transform_4, window_bounds = array<i64: 1, 1>}, {transform_indices = @transform_5, window_bounds = array<i64: 1, 8>}]} {
    %c0 = arith.constant 0 : index
    %c0_0 = arith.constant 0 : index
    %0 = vector.load %arg1[%c0, %c0_0] : memref<16x16xf32, #tpu.memory_space<vmem>>, vector<16x16xf32>
    %c0_1 = arith.constant 0 : index
    %c0_2 = arith.constant 0 : index
    %1 = vector.load %arg2[%c0_1, %c0_2] : memref<16x8xf32, #tpu.memory_space<vmem>>, vector<16x8xf32>
    %cst = arith.constant dense<0.000000e+00> : vector<16x8xf32>
    %2 = tpu.matmul %0, %1, %cst {dimension_numbers = #tpu.dot_dimension_numbers<[1], [0], [0], [1], [0, 0, 1, 1], [], []>} : vector<16x16xf32>, vector<16x8xf32>, vector<16x8xf32> -> vector<16x8xf32>
    %c0_3 = arith.constant 0 : index
    %c0_4 = arith.constant 0 : index
    %3 = vector.load %arg3[%c0_3, %c0_4] : memref<1x8xf32, #tpu.memory_space<vmem>>, vector<1x8xf32>
    %4 = vector.broadcast %3 : vector<1x8xf32> to vector<16x8xf32>
    %5 = arith.subf %2, %4 : vector<16x8xf32>
    %6 = math.absf %5 : vector<16x8xf32>
    %cst_5 = arith.constant 0.785398185 : f32
    %7 = vector.broadcast %cst_5 : f32 to vector<16x8xf32>
    %8 = arith.subf %7, %6 : vector<16x8xf32>
    %c0_6 = arith.constant 0 : index
    %c0_7 = arith.constant 0 : index
    %9 = vector.load %arg4[%c0_6, %c0_7] : memref<1x1xf32, #tpu.memory_space<vmem>>, vector<1x1xf32>
    %10 = vector.broadcast %9 : vector<1x1xf32> to vector<16x8xf32>
    %11 = arith.mulf %10, %8 : vector<16x8xf32>
    %cst_8 = arith.constant 0.000000e+00 : f32
    %12 = vector.broadcast %cst_8 : f32 to vector<16x8xf32>
    %13 = arith.subf %12, %11 : vector<16x8xf32>
    %14 = math.exp %13 : vector<16x8xf32>
    %cst_9 = arith.constant 1.000000e+00 : f32
    %15 = vector.broadcast %cst_9 : f32 to vector<16x8xf32>
    %16 = arith.addf %15, %14 : vector<16x8xf32>
    %cst_10 = arith.constant 1.000000e+00 : f32
    %17 = vector.broadcast %cst_10 : f32 to vector<16x8xf32>
    %18 = arith.divf %17, %16 : vector<16x8xf32>
    %c0_11 = arith.constant 0 : index
    %c0_12 = arith.constant 0 : index
    %19 = vector.load %arg5[%c0_11, %c0_12] : memref<1x1xf32, #tpu.memory_space<vmem>>, vector<1x1xf32>
    %cst_13 = arith.constant 5.000000e-01 : f32
    %20 = vector.broadcast %cst_13 : f32 to vector<1x1xf32>
    %21 = arith.mulf %19, %20 : vector<1x1xf32>
    %cst_14 = arith.constant 1.000000e+00 : f32
    %22 = vector.broadcast %cst_14 : f32 to vector<1x1xf32>
    %23 = arith.subf %22, %19 : vector<1x1xf32>
    %24 = vector.broadcast %23 : vector<1x1xf32> to vector<16x8xf32>
    %25 = arith.mulf %24, %18 : vector<16x8xf32>
    %26 = vector.broadcast %21 : vector<1x1xf32> to vector<16x8xf32>
    %27 = arith.addf %26, %25 : vector<16x8xf32>
    %cst_15 = arith.constant 9.900000e-01 : f32
    %28 = vector.broadcast %cst_15 : f32 to vector<16x8xf32>
    %29 = arith.mulf %27, %28 : vector<16x8xf32>
    %cst_16 = arith.constant 5.000000e-03 : f32
    %30 = vector.broadcast %cst_16 : f32 to vector<16x8xf32>
    %31 = arith.addf %29, %30 : vector<16x8xf32>
    %32 = math.log %31 : vector<16x8xf32>
    %cst_17 = arith.constant 0.000000e+00 : f32
    %33 = vector.broadcast %cst_17 : f32 to vector<16x8xf32>
    %34 = arith.subf %33, %32 : vector<16x8xf32>
    %cst_18 = arith.constant dense<0.000000e+00> : vector<8xf32>
    %35 = vector.multi_reduction <add>, %34, %cst_18 [0] : vector<16x8xf32> to vector<8xf32>
    %36 = vector.shape_cast %35 : vector<8xf32> to vector<1x8xf32>
    %c0_19 = arith.constant 0 : index
    %c0_20 = arith.constant 0 : index
    %37 = vector.load %arg6[%c0_19, %c0_20] : memref<1x8xf32, #tpu.memory_space<vmem>>, vector<1x8xf32>
    tpu.vector_store %arg6[%c0_19, %c0_20], %36 {strides = array<i32>} : memref<1x8xf32, #tpu.memory_space<vmem>>, vector<1x8xf32>,
    return
  }
  func.func @transform_0(%arg0: i32) -> (i32, i32) {
    %c0_i32 = arith.constant 0 : i32
    %c0_i32_0 = arith.constant 0 : i32
    %c0_i32_1 = arith.constant 0 : i32
    return %c0_i32, %c0_i32_0 : i32, i32
  }
  func.func @transform_1(%arg0: i32) -> (i32, i32) {
    %c0_i32 = arith.constant 0 : i32
    %c0_i32_0 = arith.constant 0 : i32
    return %c0_i32, %arg0 : i32, i32
  }
  func.func @transform_2(%arg0: i32) -> (i32, i32) {
    %c0_i32 = arith.constant 0 : i32
    %c0_i32_0 = arith.constant 0 : i32
    return %c0_i32, %arg0 : i32, i32
  }
  func.func @transform_3(%arg0: i32) -> (i32, i32) {
    %c0_i32 = arith.constant 0 : i32
    %c0_i32_0 = arith.constant 0 : i32
    %c0_i32_1 = arith.constant 0 : i32
    return %c0_i32, %c0_i32_0 : i32, i32
  }
  func.func @transform_4(%arg0: i32) -> (i32, i32) {
    %c0_i32 = arith.constant 0 : i32
    %c0_i32_0 = arith.constant 0 : i32
    %c0_i32_1 = arith.constant 0 : i32
    return %c0_i32, %c0_i32_0 : i32, i32
  }
  func.func @transform_5(%arg0: i32) -> (i32, i32) {
    %c0_i32 = arith.constant 0 : i32
    %c0_i32_0 = arith.constant 0 : i32
    return %c0_i32, %arg0 : i32, i32
  }
}

</mosaic_0001>

<bundles_post_ra>
// kernel: tpu_custom_call.1
= control target key start
LH: loop header
LB: loop body
LE: loop exit
PB: predicated region body
PF: predicated region fallthrough
CT: control target
= control target key end

     0   :  { %s335_s0 = inlined_call_operand.vmem [shape: f32[16,16], index: 0, kind: input, shape index: {}]   ;;  %s336_s1 = inlined_call_operand.vmem [shape: f32[16,8], index: 1, kind: input, shape index: {}]   ;;  %s337_s2 = inlined_call_operand.vmem [shape: f32[1,8], index: 2, kind: input, shape index: {}]   ;;  %s338_s3 = inlined_call_operand.<no memory space> [shape: f32[1,1], index: 3, kind: input, shape index: {}]   ;;  %s339_s5 = inlined_call_operand.hbm [shape: f32[1,8], index: 5, kind: output, shape index: {}]   ;;  %s340_s4 = inlined_call_operand.<no memory space> [shape: f32[1,1], index: 4, kind: input, shape index: {}]  }
   0x1   :  { %v10_v0 = vstv %s338_s3  ;;  %v12_v1 = vstv %s340_s4 }
   0x2   :  { %11 = vst [vmem:[#allocation2] sm:$0x1] %v10_v0  ;;  %13 = vst [vmem:[#allocation3] sm:$0x1] %v12_v1 }
   0x3   :  { %v27_v2 = vld [vmem:[%s336_s1] sm:$0xff]  ;;  %v28_v3 = vld [vmem:[%s336_s1 + $0x8] sm:$0xff]  ;;  %vm29_vm0 = vcmask 130048   ;;  %v152_v5 = vlaneseq  ;;  %v268_v7 = vmov 0  }
   0x4   :  { %v25_v4 = vld [vmem:[%s335_s0] sm:$0xff]  ;;  %v224_v6 = vpack.c.bf16 %v28_v3, %v27_v2  ;;  %230 = vset.pattern.permute.xlu0 %v268_v7  ;;  %231 = vset.pattern.permute.xlu1 %v268_v7 }
   0x5   :  { %221 = vmatprep.mubr.msk.f32.mxu0 %vm29_vm0, %v25_v4  ;;  %v153_v11 = vshrl.u32 %v152_v5, 7 }
   0x9   :  { %v212_v8 = vld [vmem:[#allocation2] ss:$0 sm:$0xff]  ;;  %v148_v9 = vld [vmem:[#allocation3] sm:$0x1] }
   0xa   :  { %131 = vperm.xlu0 %230, %v212_v8   ;;  %v150_v10 = vsub.f32 1.0, %v148_v9  ;;  %v149_v12 = vmul.f32 0.5, %v148_v9 }
   0xb   :  { %14 = vsyncpa [#allocation5], 0  ;;  %225 = vmatprep.subr.bf16.mxu0 %v224_v6  ;;  %v26_v13 = vld [vmem:[%s335_s0 + $0x8] sm:$0xff]  ;;  %v154_v14 = vsub.s32 0, %v153_v11  ;;  %v211_v17 = vld [vmem:[%s337_s2] ss:$0 sm:$0xff] }
   0xc   :  { %227 = vmatpush3.bf16.msra.mxu0 %v224_v6  ;;  %vm183_vm1 = vcmask 64512   ;;  %s269_s0 = smov [#allocation4]   ;;  %vm193_vm2 = vcmask 57344  }
   0xd   :  { %v155_v15 = vrot.slane %v150_v10, %v154_v14  ;;  %v166_v16 = vrot.slane %v149_v12, %v154_v14  ;;  %s201_s2 = sshll.u32 %s269_s0, 4  ;;  %s202_s2 = int_to_ptr.vmem [resolvable:$true] %s201_s2 }
   0xe   :  { %s244_s29 = scalar_lea.vmem %s202_s2, 16  ;;  %s248_s30 = scalar_lea.vmem %s202_s2, 32 }
   0xf   :  { %222 = vmatmul.mubr.msk.f32.vlgmr.msra.gmra.mrb[0].mxu0 %vm29_vm0, %v26_v13  ;;  %157 = vperm.xlu0 %230, %v155_v15   ;;  %p245_p0 = scmp.ne.s32.totalorder %s202_s2, %s244_s29  ;;  %p249_p1 = scmp.lt.s32.totalorder %s202_s2, %s202_s2 }
  0x10   :  { %168 = vperm.xlu1 %231, %v166_v16   ;;  %p250_p2 = scmp.lt.s32.totalorder %s248_s30, %s244_s29 }
  0x12   :  { %p251_p3 = por %p250_p2, %p249_p1 }
  0x14   :  { %p252_p4 = pnand %p251_p3, %p245_p0 }
  0x89   :  { %v132_v26 = vpop.permute.xlu0 %131 }
  0x8e   :  { %v158_v38 = vpop.permute.xlu0 %157 }
  0x8f   :  { %v169_v39 = vpop.permute.xlu1 %168 }
  0xe2   :  { %v223_v18 = vpop.f32.mrb[0].mxu0 }
  0xe3   :  { %v119_v19 = vsub.f32 %v223_v18, %v211_v17  ;;  %v102_v20 = vpop.f32.mrb[1].mxu0 }
  0xe4   :  { %v118_v21 = vsub.f32 %v102_v20, %v211_v17 }
  0xe5   :  { %v121_v22 = vand.u32 2147483647, %v119_v19 }
  0xe6   :  { %v120_v23 = vand.u32 2147483647, %v118_v21 }
  0xe7   :  { %v123_v24 = vsub.f32 0.7853982, %v121_v22 }
  0xe8   :  { %v122_v25 = vsub.f32 0.7853982, %v120_v23 }
  0xe9   :  { %v135_v27 = vmul.f32 %v132_v26, %v123_v24 }
  0xea   :  { %v134_v28 = vmul.f32 %v132_v26, %v122_v25 }
  0xeb   :  { %v137_v29 = vsub.f32 0.0, %v135_v27 }
  0xec   :  { %v136_v30 = vsub.f32 0.0, %v134_v28 }
  0xed   :  { %v140_v31 = vmul.f32 1.442695, %v137_v29 }
  0xee   :  { %v138_v32 = vmul.f32 1.442695, %v136_v30 }
  0xef   :  { %232 = vpow2.f32 %v140_v31 }
  0xf0   :  { %234 = vpow2.f32 %v138_v32 }
  0xf9   :  { %v233_v33 = vpop.eup %232 }
  0xfa   :  { %v235_v34 = vpop.eup %234  ;;  %v143_v35 = vadd.f32 1.0, %v233_v33 }
  0xfb   :  { %v142_v36 = vadd.f32 1.0, %v235_v34 }
  0xfc   :  { %236 = vrcp.f32 %v143_v35 }
  0xfd   :  { %238 = vrcp.f32 %v142_v36 }
 0x106   :  { %v237_v37 = vpop.eup %236 }
 0x107   :  { %v239_v40 = vpop.eup %238  ;;  %v161_v41 = vmul.f32 %v237_v37, %v158_v38 }
 0x108   :  { %v160_v42 = vmul.f32 %v239_v40, %v158_v38 }
 0x109   :  { %v172_v43 = vadd.f32 %v169_v39, %v161_v41 }
 0x10a   :  { %v171_v44 = vadd.f32 %v169_v39, %v160_v42 }
 0x10b   :  { %v174_v45 = vmul.f32 0.99, %v172_v43 }
 0x10c   :  { %v173_v46 = vmul.f32 0.99, %v171_v44 }
 0x10d   :  { %v176_v47 = vadd.f32 0.005, %v174_v45 }
 0x10e   :  { %v175_v48 = vadd.f32 0.005, %v173_v46 }
 0x10f   :  { %240 = vlog2.f32 %v176_v47 }
 0x110   :  { %242 = vlog2.f32 %v175_v48 }
 0x119   :  { %v241_v49 = vpop.eup %240 }
 0x11a   :  { %v243_v50 = vpop.eup %242  ;;  %v180_v51 = vmul.f32 0.6931472, %v241_v49 }
 0x11b   :  { %v178_v52 = vmul.f32 0.6931472, %v243_v50 }
 0x11c   :  { %v182_v53 = vsub.f32 0.0, %v180_v51 }
 0x11d   :  { %v181_v54 = vsub.f32 0.0, %v178_v52 }
 0x11e   :  { %v185_v55 = vsel %vm183_vm1, %v182_v53, 0.0 }
 0x11f   :  { %v184_v56 = vsel %vm183_vm1, %v181_v54, 0.0 }
 0x120   :  { %v186_v57 = vadd.f32 %v185_v55, %v184_v56 }
 0x122   :  { %v187_v58 = vrot.slane %v186_v57, 4 }
 0x124   :  { %v188_v59 = vadd.f32 %v187_v58, %v186_v57 }
 0x126   :  { %v189_v60 = vrot.slane %v188_v59, 2 }
 0x128   :  { %v190_v61 = vadd.f32 %v189_v60, %v188_v59 }
 0x12a   :  { %v191_v62 = vrot.slane %v190_v61, 1 }
 0x12c   :  { %v192_v63 = vadd.f32 %v191_v62, %v190_v61 }
 0x12e   :  { %194 = vst.msk [vmem:[#allocation4] sm:$0x1] %vm193_vm2, %v192_v63 }
 0x12f   :  { %255 = shalt.err (!%p252_p4)
}
 0x130   :  { %s256_s8 = scalar_lea.hbm %s339_s5, 16 }
 0x131   :  { %p257_p5 = scmp.ne.s32.totalorder %s339_s5, %s256_s8  ;;  %p260_p6 = scmp.lt.u32.totalorder %s256_s8, %s339_s5 }
 0x133   :  { %p262_p7 = pnand %p260_p6, %p257_p5 }
 0x135   :  { %265 = shalt.err (!%p262_p7)
}
 0x136   :  { %204 = dma.vmem_to_hbm [thread:$0]  %s202_s2, 16, %s339_s5, [#allocation5]  }
 0x137   :  { %266 = dma.done.wait [#allocation5], 16  }
 0x138   :  { %267 = vsyncadd [#allocation5], 4294967280 }
 0x139   :  { %208 = vsyncpa [#allocation5], 1 }

</bundles_post_ra>
